<compile_context>
chip_gen: v5e
topology: v5e:2x2
jax: 0.10.0
libtpu: 0.0.40
codegen_flags: <defaults>
</compile_context>

<pallas_src>
import functools

import jax
import jax.numpy as jnp
from jax import lax
from jax.experimental import pallas as pl
from jax.experimental.pallas import tpu as pltpu

LOG_STD_MIN = -20.0
LOG_STD_MAX = 2.0


def _sac_actor_kernel(obs_ref, w1_ref, b1_ref, w2_ref, b2_ref, wh_ref, bh_ref,
                      out_ref, *, out_dim):
    """fc1 -> relu -> fc2 -> relu -> fused {mean|log_std} head -> clamp(log_std half)."""
    # Matmul operand dtype follows the weights (f32 or bf16); accumulation is
    # always f32 via preferred_element_type; the elementwise epilogue stays f32.
    mm_dtype = w1_ref.dtype

    # fc1 + relu
    h1 = jnp.dot(obs_ref[...], w1_ref[...],
                 preferred_element_type=jnp.float32) + b1_ref[...]
    h1 = jnp.maximum(h1, 0.0).astype(mm_dtype)

    # fc2 + relu
    h2 = jnp.dot(h1, w2_ref[...],
                 preferred_element_type=jnp.float32) + b2_ref[...]
    h2 = jnp.maximum(h2, 0.0).astype(mm_dtype)

    # Fused heads: one matmul produces [mean | log_std] along the lane axis.
    heads = jnp.dot(h2, wh_ref[...],
                    preferred_element_type=jnp.float32) + bh_ref[...]

    # Clamp only the log_std half. Use a lane mask (iota >= out_dim) instead of
    # slicing/concatenating across a sub-128 lane boundary.
    col = lax.broadcasted_iota(jnp.int32, heads.shape, 1)
    clamped = jnp.clip(heads, LOG_STD_MIN, LOG_STD_MAX)
    out_ref[...] = jnp.where(col >= out_dim, clamped, heads).astype(out_ref.dtype)


@functools.partial(jax.jit, static_argnames=("use_bf16_matmul", "batch_tile"))
def sac_actor_forward(obs, w1, b1, w2, b2, w_head, b_head,
                      use_bf16_matmul=False, batch_tile=256):
    """Returns (mean, log_std), matching SACActor.forward."""
    batch, input_dim = obs.shape
    two_out = w_head.shape[1]
    out_dim = two_out // 2

    if use_bf16_matmul:
        # Cast matmul operands in the wrapper so weight DMAs are half the bytes.
        # Biases stay f32 (added to the f32 accumulator).
        obs = obs.astype(jnp.bfloat16)
        w1 = w1.astype(jnp.bfloat16)
        w2 = w2.astype(jnp.bfloat16)
        w_head = w_head.astype(jnp.bfloat16)

    kernel = functools.partial(_sac_actor_kernel, out_dim=out_dim)
    out_shape = jax.ShapeDtypeStruct((batch, two_out), jnp.float32)
    args = (obs, w1, b1, w2, b2, w_head, b_head)

    if batch % batch_tile == 0 and batch // batch_tile > 1:
        # Batch-tiled path for large batches: grid over batch tiles, weights get
        # the same block index every step (stay VMEM-resident), and the parallel
        # axis lets v7x split tiles across its two TensorCores.
        n_tiles = batch // batch_tile
        in_specs = [pl.BlockSpec((batch_tile, input_dim), lambda i: (i, 0))]
        in_specs += [pl.BlockSpec(a.shape, lambda i: (0, 0)) for a in args[1:]]
        out_specs = pl.BlockSpec((batch_tile, two_out), lambda i: (i, 0))
        fused = pl.pallas_call(
            kernel,
            grid=(n_tiles,),
            in_specs=in_specs,
            out_specs=out_specs,
            out_shape=out_shape,
            compiler_params=pltpu.CompilerParams(
                dimension_semantics=("parallel",)),
        )(*args)
    else:
        # Small-batch path: no grid, no pipelining — the whole problem is a few
        # KiB, so every operand is a single full-array VMEM block.
        vmem = pl.BlockSpec(memory_space=pltpu.MemorySpace.VMEM)
        fused = pl.pallas_call(
            kernel,
            in_specs=[vmem] * len(args),
            out_specs=vmem,
            out_shape=out_shape,
        )(*args)

    # Split the lane-dense fused output back into (mean, log_std) in the wrapper.
    return fused[:, :out_dim], fused[:, out_dim:]


def init_params(key, input_dim, hidden_dim, output_dim):
    """PyTorch-Linear-style uniform init. Weights (in, out); biases (1, out)."""
    keys = jax.random.split(key, 8)

    def linear(kw, kb, fan_in, fan_out):
        bound = 1.0 / jnp.sqrt(jnp.float32(fan_in))
        w = jax.random.uniform(kw, (fan_in, fan_out), jnp.float32, -bound, bound)
        b = jax.random.uniform(kb, (1, fan_out), jnp.float32, -bound, bound)
        return w, b

    w1, b1 = linear(keys[0], keys[1], input_dim, hidden_dim)
    w2, b2 = linear(keys[2], keys[3], hidden_dim, hidden_dim)
    wm, bm = linear(keys[4], keys[5], hidden_dim, output_dim)
    ws, bs = linear(keys[6], keys[7], hidden_dim, output_dim)
    return w1, b1, w2, b2, wm, bm, ws, bs


def pack_params(w1, b1, w2, b2, wm, bm, ws, bs):
    """Fuse the two head layers into one operand pair (done once, offline)."""
    w_head = jnp.concatenate([wm, ws], axis=1)   # (hidden, 2*out)
    b_head = jnp.concatenate([bm, bs], axis=1)   # (1, 2*out)
    return w1, b1, w2, b2, w_head, b_head


def reference_forward(obs, w1, b1, w2, b2, wm, bm, ws, bs):
    x = jnp.maximum(obs @ w1 + b1, 0.0)
    x = jnp.maximum(x @ w2 + b2, 0.0)
    mean = x @ wm + bm
    log_std = jnp.clip(x @ ws + bs, LOG_STD_MIN, LOG_STD_MAX)
    return mean, log_std


if __name__ == "__main__":
    key = jax.random.PRNGKey(0)
    k_obs, k_obs_big, k_params = jax.random.split(key, 3)

    batch, input_dim, hidden_dim, output_dim = 8, 16, 32, 4

    raw_params = init_params(k_params, input_dim, hidden_dim, output_dim)
    packed_params = pack_params(*raw_params)

    obs = jax.random.normal(k_obs, (batch, input_dim), jnp.float32)
    ref_mean, ref_log_std = reference_forward(obs, *raw_params)

    # 1) Small batch, f32 operands (no-grid VMEM path) — exact parity check.
    mean, log_std = sac_actor_forward(obs, *packed_params)
    jax.block_until_ready((mean, log_std))
    assert mean.shape == (batch, output_dim)
    assert log_std.shape == (batch, output_dim)
    assert jnp.allclose(mean, ref_mean, atol=1e-5, rtol=1e-5)
    assert jnp.allclose(log_std, ref_log_std, atol=1e-5, rtol=1e-5)

    # 2) Small batch, bf16 matmul operands (f32 accumulate) — loose tolerance.
    mean_bf, log_std_bf = sac_actor_forward(obs, *packed_params,
                                            use_bf16_matmul=True)
    jax.block_until_ready((mean_bf, log_std_bf))
    assert jnp.allclose(mean_bf, ref_mean, atol=5e-2, rtol=5e-2)
    assert jnp.allclose(log_std_bf, ref_log_std, atol=5e-2, rtol=5e-2)

    # 3) Larger batch exercising the batch-tiled ("parallel") path.
    big_batch = 512
    obs_big = jax.random.normal(k_obs_big, (big_batch, input_dim), jnp.float32)
    mean_b, log_std_b = sac_actor_forward(obs_big, *packed_params, batch_tile=256)
    jax.block_until_ready((mean_b, log_std_b))
    ref_mean_b, ref_log_std_b = reference_forward(obs_big, *raw_params)
    assert jnp.allclose(mean_b, ref_mean_b, atol=1e-5, rtol=1e-5)
    assert jnp.allclose(log_std_b, ref_log_std_b, atol=1e-5, rtol=1e-5)

    # TODO(synk): get_action / evaluate (torch.randn sampling, tanh squashing,
    # Normal.log_prob) stay outside the kernel; only forward() is implemented.
    print("KERNEL_OK")
</pallas_src>

<mosaic_0001>
module attributes {stable_mosaic.version = 11 : i64} {
  func.func @_sac_actor_kernel(%arg0: memref<8x16xf32, #tpu.memory_space<vmem>>, %arg1: memref<16x32xf32, #tpu.memory_space<vmem>>, %arg2: memref<1x32xf32, #tpu.memory_space<vmem>>, %arg3: memref<32x32xf32, #tpu.memory_space<vmem>>, %arg4: memref<1x32xf32, #tpu.memory_space<vmem>>, %arg5: memref<32x8xf32, #tpu.memory_space<vmem>>, %arg6: memref<1x8xf32, #tpu.memory_space<vmem>>, %arg7: memref<8x8xf32, #tpu.memory_space<vmem>>) attributes {dimension_semantics = [], scalar_prefetch = 0 : i64, scratch_operands = 0 : i64, tpu.core_type = #tpu.core_type<tc>} {
    %c0 = arith.constant 0 : index
    %c0_0 = arith.constant 0 : index
    %0 = vector.load %arg0[%c0, %c0_0] : memref<8x16xf32, #tpu.memory_space<vmem>>, vector<8x16xf32>
    %c0_1 = arith.constant 0 : index
    %c0_2 = arith.constant 0 : index
    %1 = vector.load %arg1[%c0_1, %c0_2] : memref<16x32xf32, #tpu.memory_space<vmem>>, vector<16x32xf32>
    %cst = arith.constant dense<0.000000e+00> : vector<8x32xf32>
    %2 = tpu.matmul %0, %1, %cst {dimension_numbers = #tpu.dot_dimension_numbers<[1], [0], [0], [1], [0, 0, 1, 1], [], []>} : vector<8x16xf32>, vector<16x32xf32>, vector<8x32xf32> -> vector<8x32xf32>
    %c0_3 = arith.constant 0 : index
    %c0_4 = arith.constant 0 : index
    %3 = vector.load %arg2[%c0_3, %c0_4] : memref<1x32xf32, #tpu.memory_space<vmem>>, vector<1x32xf32>
    %4 = vector.broadcast %3 : vector<1x32xf32> to vector<8x32xf32>
    %5 = arith.addf %2, %4 : vector<8x32xf32>
    %cst_5 = arith.constant 0.000000e+00 : f32
    %6 = vector.broadcast %cst_5 : f32 to vector<8x32xf32>
    %7 = arith.maximumf %5, %6 : vector<8x32xf32>
    %c0_6 = arith.constant 0 : index
    %c0_7 = arith.constant 0 : index
    %8 = vector.load %arg3[%c0_6, %c0_7] : memref<32x32xf32, #tpu.memory_space<vmem>>, vector<32x32xf32>
    %cst_8 = arith.constant dense<0.000000e+00> : vector<8x32xf32>
    %9 = tpu.matmul %7, %8, %cst_8 {dimension_numbers = #tpu.dot_dimension_numbers<[1], [0], [0], [1], [0, 0, 1, 1], [], []>} : vector<8x32xf32>, vector<32x32xf32>, vector<8x32xf32> -> vector<8x32xf32>
    %c0_9 = arith.constant 0 : index
    %c0_10 = arith.constant 0 : index
    %10 = vector.load %arg4[%c0_9, %c0_10] : memref<1x32xf32, #tpu.memory_space<vmem>>, vector<1x32xf32>
    %11 = vector.broadcast %10 : vector<1x32xf32> to vector<8x32xf32>
    %12 = arith.addf %9, %11 : vector<8x32xf32>
    %cst_11 = arith.constant 0.000000e+00 : f32
    %13 = vector.broadcast %cst_11 : f32 to vector<8x32xf32>
    %14 = arith.maximumf %12, %13 : vector<8x32xf32>
    %c0_12 = arith.constant 0 : index
    %c0_13 = arith.constant 0 : index
    %15 = vector.load %arg5[%c0_12, %c0_13] : memref<32x8xf32, #tpu.memory_space<vmem>>, vector<32x8xf32>
    %cst_14 = arith.constant dense<0.000000e+00> : vector<8x8xf32>
    %16 = tpu.matmul %14, %15, %cst_14 {dimension_numbers = #tpu.dot_dimension_numbers<[1], [0], [0], [1], [0, 0, 1, 1], [], []>} : vector<8x32xf32>, vector<32x8xf32>, vector<8x8xf32> -> vector<8x8xf32>
    %c0_15 = arith.constant 0 : index
    %c0_16 = arith.constant 0 : index
    %17 = vector.load %arg6[%c0_15, %c0_16] : memref<1x8xf32, #tpu.memory_space<vmem>>, vector<1x8xf32>
    %18 = vector.broadcast %17 : vector<1x8xf32> to vector<8x8xf32>
    %19 = arith.addf %16, %18 : vector<8x8xf32>
    %20 = tpu.iota {dimensions = array<i32: 1>} : vector<8x8xi32>
    %cst_17 = arith.constant -2.000000e+01 : f32
    %cst_18 = arith.constant 2.000000e+00 : f32
    %21 = vector.broadcast %cst_17 : f32 to vector<8x8xf32>
    %22 = arith.maximumf %21, %19 : vector<8x8xf32>
    %23 = vector.broadcast %cst_18 : f32 to vector<8x8xf32>
    %24 = arith.minimumf %23, %22 : vector<8x8xf32>
    %c4_i32 = arith.constant 4 : i32
    %25 = vector.broadcast %c4_i32 : i32 to vector<8x8xi32>
    %26 = arith.cmpi sge, %20, %25 : vector<8x8xi32>
    %27 = arith.select %26, %24, %19 : vector<8x8xi1>, vector<8x8xf32>
    %c0_19 = arith.constant 0 : index
    %c0_20 = arith.constant 0 : index
    %28 = vector.load %arg7[%c0_19, %c0_20] : memref<8x8xf32, #tpu.memory_space<vmem>>, vector<8x8xf32>
    tpu.vector_store %arg7[%c0_19, %c0_20], %27 {strides = array<i32>} : memref<8x8xf32, #tpu.memory_space<vmem>>, vector<8x8xf32>,
    return
  }
}

</mosaic_0001>

<bundles_post_ra>
// kernel: sac_actor_forward.1
= control target key start
LH: loop header
LB: loop body
LE: loop exit
PB: predicated region body
PF: predicated region fallthrough
CT: control target
= control target key end

     0   :  { %12 = vsyncpa [#allocation3], 0  ;;  %s186_s27 = smov [#allocation2]   ;;  %s187_s29 = smov 128   ;;  %s271_s0 = inlined_call_operand.vmem [shape: f32[8,16], index: 0, kind: input, shape index: {}]   ;;  %s272_s1 = inlined_call_operand.hbm [shape: f32[16,32], index: 1, kind: input, shape index: {}]   ;;  %s273_s2 = inlined_call_operand.vmem [shape: f32[1,32], index: 2, kind: input, shape index: {}]   ;;  %s274_s3 = inlined_call_operand.vmem [shape: f32[32,32], index: 3, kind: input, shape index: {}]   ;;  %s275_s4 = inlined_call_operand.vmem [shape: f32[1,32], index: 4, kind: input, shape index: {}]   ;;  %s276_s5 = inlined_call_operand.vmem [shape: f32[32,8], index: 5, kind: input, shape index: {}]   ;;  %s277_s6 = inlined_call_operand.vmem [shape: f32[1,8], index: 6, kind: input, shape index: {}]   ;;  %s278_s7 = inlined_call_operand.vmem [shape: f32[8,8], index: 7, kind: output, shape index: {}]  }
   0x1   :  { %s19_s26 = sshll.u32 %s272_s1, 4  ;;  %s21_s28 = sshll.u32 %s186_s27, 4  ;;  %s20_s26 = int_to_ptr.hbm [resolvable:$true] %s19_s26  ;;  %s22_s28 = int_to_ptr.vmem [resolvable:$true] %s21_s28 }
   0x2   :  { %s188_s30 = smov 8  }
   0x3   :  { %27 = dma.hbm_to_vmem [thread:$0]  %s20_s26, 256, %s22_s28, [#allocation3], %s187_s29, %s187_s29, %s188_s30  }
   0x4   :  { %184 = dma.done.wait [#allocation3], 256  }
   0x5   :  { %185 = vsyncadd [#allocation3], 4294967040  ;;  %v44_v0 = vld [vmem:[#allocation2 + $0x8] sm:$0xff]  ;;  %v43_v1 = vld [vmem:[#allocation2] sm:$0xff]  ;;  %vm49_vm0 = vcmask 130048   ;;  %vm82_vm1 = vcmask 261120   ;;  %v138_v19 = vlaneseq }
   0x6   :  { %67 = vmatpush.msra.mxu0 %v44_v0  ;;  %v42_v2 = vld [vmem:[%s271_s0] sm:$0xff]  ;;  %v77_v3 = vld [vmem:[%s274_s3 + $0x18] sm:$0xff]  ;;  %v76_v4 = vld [vmem:[%s274_s3 + $0x10] sm:$0xff]  ;;  %vm144_vm3 = vcmask 64512  }
   0x7   :  { %98 = vmatpush.msra.mxu1 %v77_v3  ;;  %v75_v5 = vld [vmem:[%s274_s3 + $0x8] sm:$0xff]  ;;  %v74_v6 = vld [vmem:[%s274_s3] sm:$0xff]  ;;  %v110_v7 = vld [vmem:[%s276_s5 + $0x18] sm:$0xff]  ;;  %v139_v22 = vand.u32 127, %v138_v19 }
   0x8   :  { %68 = vmatpush.msra.mxu0 %v43_v1  ;;  %130 = vmatpush.msra.mxu2 %v110_v7  ;;  %v157_v8 = vld [vmem:[%s273_s2] ss:$0 sm:$0xff]  ;;  %v109_v12 = vld [vmem:[%s276_s5 + $0x10] sm:$0xff]  ;;  %v108_v13 = vld [vmem:[%s276_s5 + $0x8] sm:$0xff] }
   0x9   :  { %151 = vmatmul.msk.f32.vlgmr.msra.gmra.mxu0 %vm49_vm0, %v42_v2  ;;  %99 = vmatpush.msra.mxu1 %v76_v4  ;;  %v107_v14 = vld [vmem:[%s276_s5] sm:$0xff]  ;;  %vm142_vm2 = vcmp.ge.s32.totalorder %v139_v22, 4 }
   0xa   :  { %131 = vmatpush.msra.mxu2 %v109_v12  ;;  %v158_v15 = vld [vmem:[%s275_s4] ss:$0 sm:$0xff] }
   0xb   :  { %100 = vmatpush.msra.mxu1 %v75_v5  ;;  %v159_v20 = vld [vmem:[%s277_s6] ss:$0 sm:$0xff] }
   0xc   :  { %132 = vmatpush.msra.mxu2 %v108_v13 }
   0xd   :  { %101 = vmatpush.msra.mxu1 %v74_v6 }
   0xe   :  { %133 = vmatpush.msra.mxu2 %v107_v14 }
  0x86   :  { %v70_v9 = vpop.f32.mrf.mxu0 }
  0x87   :  { %v71_v10 = vadd.f32 %v157_v8, %v70_v9 }
  0x89   :  { %v73_v11 = vmax.f32 %v71_v10, 0.0 }
  0x8b   :  { %152 = vmatmul.msk.f32.vlgmr.msra.gmra.mxu1 %vm82_vm1, %v73_v11 }
 0x108   :  { %v103_v16 = vpop.f32.mrf.mxu1 }
 0x109   :  { %v104_v17 = vadd.f32 %v158_v15, %v103_v16 }
 0x10b   :  { %v106_v18 = vmax.f32 %v104_v17, 0.0 }
 0x10d   :  { %153 = vmatmul.msk.f32.vlgmr.msra.gmra.mxu2 %vm82_vm1, %v106_v18 }
 0x190   :  { %v135_v21 = vpop.f32.mrf.mxu2 }
 0x191   :  { %v136_v23 = vadd.f32 %v159_v20, %v135_v21 }
 0x193   :  { %v140_v24 = vmax.f32 %v136_v23, -20.0 }
 0x195   :  { %v141_v25 = vmin.f32 %v140_v24, 2.0 }
 0x197   :  { %v143_v26 = vsel %vm142_vm2, %v141_v25, %v136_v23 }
 0x198   :  { %145 = vst.msk [vmem:[%s278_s7] sm:$0xff] %vm144_vm3, %v143_v26 }
 0x199   :  { %150 = vsyncpa [#allocation3], 1 }

</bundles_post_ra>
